<compile_context>
chip_gen: v5e
topology: v5e:2x2
jax: 0.10.0
libtpu: 0.0.40
codegen_flags: <defaults>
</compile_context>

<pallas_src>
import functools

import jax
import jax.numpy as jnp
from jax import lax
from jax.experimental import pallas as pl
from jax.experimental.pallas import tpu as pltpu

_EPS = 1e-5
_MIB = 1024 * 1024


# ---------------------------------------------------------------------------
# VMEM budgeting (generation-aware).
# ---------------------------------------------------------------------------
def _vmem_capacity_bytes():
    """Per-core VMEM capacity; conservative 64 MiB (v7x) fallback."""
    try:
        info = pltpu.get_tpu_info()
        cap = getattr(info, "vmem_capacity_bytes", None)
        if cap:
            return int(cap)
    except Exception:
        pass
    return 64 * _MIB


def _vmem_budget_bytes():
    """Scoped-VMEM ceiling we are willing to request: 3/4 of capacity, <=96 MiB."""
    cap = _vmem_capacity_bytes()
    return max(32 * _MIB, min((cap * 3) // 4, 96 * _MIB))


def _scoped_vmem_limit(footprint_bytes, budget):
    """vmem_limit_bytes derived from the actual footprint (+headroom), clamped."""
    want = 2 * int(footprint_bytes) + 8 * _MIB
    return int(min(max(want, 32 * _MIB), budget))


def _choose_tile_l(l_pad, bytes_per_col, tile_budget):
    """Largest 128-multiple tile of the (padded) L axis that divides l_pad,
    keeps double-buffered streamed blocks within tile_budget, and is <=8192."""
    max_cols = max(128, tile_budget // (2 * bytes_per_col))
    t = min(l_pad, 8192, (max_cols // 128) * 128)
    t = max(t, 128)
    while l_pad % t:
        t -= 128
    return t


# ---------------------------------------------------------------------------
# Resident single-pass path (small problems): x/a read from HBM exactly once.
# ---------------------------------------------------------------------------
def _fused_resident_kernel(x_ref, a_ref, gamma_ref, beta_ref,
                           wx_ref, wa_ref, b_ref, o_ref):
    # x_ref: (N, Cx, L)  a_ref: (N, Ca, L)  gamma/beta: (Cx, 1)
    # wx: (Cout, Cx)  wa: (Cout, Ca)  b: (Cout, 1)  o_ref: (N, Cout, L)
    x = x_ref[...]
    n = x.shape[0]
    count = float(n * x.shape[2])

    # Exact two-pass batch statistics (matches PyTorch's centered batch stats).
    sum_c = jnp.sum(jnp.sum(x, axis=2, keepdims=True), axis=0, keepdims=True)
    mean = sum_c / count                                           # (1, Cx, 1)
    d = x - mean
    var = jnp.sum(jnp.sum(d * d, axis=2, keepdims=True), axis=0,
                  keepdims=True) / count                           # (1, Cx, 1)

    inv_std = lax.rsqrt(var + _EPS)
    scale = gamma_ref[...][None, :, :] * inv_std                   # (1, Cx, 1)
    shift = beta_ref[...][None, :, :] - mean * scale
    y = x * scale + shift                                          # BN(x)

    wx = wx_ref[...]
    wa = wa_ref[...]
    bias = b_ref[...]
    for i in range(n):  # static tiny N (resident path is small problems only)
        out_i = jnp.dot(wx, y[i], preferred_element_type=jnp.float32)
        out_i = out_i + jnp.dot(wa, a_ref[i], preferred_element_type=jnp.float32)
        o_ref[i] = (out_i + bias).astype(o_ref.dtype)


def _prenorm_fused_resident(x, a, gamma, beta, w, b, vmem_limit):
    n, cx, l = x.shape
    _, ca, _ = a.shape
    cout = w.shape[0]
    const3 = lambda i: (0, 0, 0)
    const2 = lambda i: (0, 0)
    return pl.pallas_call(
        _fused_resident_kernel,
        out_shape=jax.ShapeDtypeStruct((n, cout, l), jnp.float32),
        grid_spec=pltpu.PrefetchScalarGridSpec(
            num_scalar_prefetch=0,
            grid=(1,),
            in_specs=[
                pl.BlockSpec((n, cx, l), const3),
                pl.BlockSpec((n, ca, l), const3),
                pl.BlockSpec((cx, 1), const2),
                pl.BlockSpec((cx, 1), const2),
                pl.BlockSpec((cout, cx), const2),
                pl.BlockSpec((cout, ca), const2),
                pl.BlockSpec((cout, 1), const2),
            ],
            out_specs=pl.BlockSpec((n, cout, l), const3),
        ),
        compiler_params=pltpu.CompilerParams(
            dimension_semantics=("arbitrary",),
            vmem_limit_bytes=vmem_limit,
        ),
    )(x, a, gamma.reshape(cx, 1), beta.reshape(cx, 1),
      w[:, :cx], w[:, cx:], b.reshape(cout, 1))


# ---------------------------------------------------------------------------
# Streaming path, Pass 1: per-sample partial BN statistics (shifted sums).
# ---------------------------------------------------------------------------
def _bn_partial_stats_kernel(x_ref, c_ref, sum_ref, sumsq_ref,
                             *, tile_l, valid_l, masked):
    # x_ref: (Cx, tile_L)   c/sum/sumsq: (Cx, 1), per-sample output blocks.
    l_i = pl.program_id(1)

    @pl.when(l_i == 0)
    def _init():
        # Cheap per-channel shift estimate (first tile mean) -> the centered
        # sums below cancel exactly in the wrapper combine, so only the
        # conditioning (not the value) of this estimate matters.
        c_ref[...] = jnp.mean(x_ref[...], axis=-1, keepdims=True)
        sum_ref[...] = jnp.zeros_like(sum_ref)
        sumsq_ref[...] = jnp.zeros_like(sumsq_ref)

    xc = x_ref[...] - c_ref[...]
    if masked:  # padded (non-128-multiple) L: zero out pad columns
        lane = lax.broadcasted_iota(jnp.int32, xc.shape, dimension=1)
        xc = jnp.where(l_i * tile_l + lane < valid_l, xc, 0.0)

    sum_ref[...] += jnp.sum(xc, axis=-1, keepdims=True)
    sumsq_ref[...] += jnp.sum(xc * xc, axis=-1, keepdims=True)


def _bn_partial_stats(x_p, tile_l, valid_l, vmem_limit):
    n, cx, l_pad = x_p.shape
    grid = (n, l_pad // tile_l)
    kernel = functools.partial(_bn_partial_stats_kernel, tile_l=tile_l,
                               valid_l=valid_l, masked=(l_pad != valid_l))
    part_shape = jax.ShapeDtypeStruct((n, cx, 1), jnp.float32)
    part_spec = pl.BlockSpec((None, cx, 1), lambda n_i, l_i: (n_i, 0, 0))
    return pl.pallas_call(
        kernel,
        out_shape=(part_shape, part_shape, part_shape),
        grid_spec=pltpu.PrefetchScalarGridSpec(
            num_scalar_prefetch=0,
            grid=grid,
            in_specs=[pl.BlockSpec((None, cx, tile_l),
                                   lambda n_i, l_i: (n_i, 0, l_i))],
            out_specs=[part_spec, part_spec, part_spec],
        ),
        compiler_params=pltpu.CompilerParams(
            # N axis has independent per-sample output blocks -> parallel
            # (v7x megacore); L is the in-sample reduction -> arbitrary, last.
            dimension_semantics=("parallel", "arbitrary"),
            vmem_limit_bytes=vmem_limit,
        ),
    )(x_p)


# ---------------------------------------------------------------------------
# Streaming path, Pass 2: (folded-affine) 1x1 conv over the implicit concat.
# ---------------------------------------------------------------------------
def _apply_kernel(x_ref, a_ref, wx_ref, wa_ref, b_ref, o_ref):
    # x_ref: (Cx, tile_L)  a_ref: (Ca, tile_L)
    # wx: (Cout, Cx) already scaled by BN scale; b: (Cout, 1) already shifted.
    out = jnp.dot(wx_ref[...], x_ref[...], preferred_element_type=jnp.float32)
    out = out + jnp.dot(wa_ref[...], a_ref[...],
                        preferred_element_type=jnp.float32)
    o_ref[...] = (out + b_ref[...]).astype(o_ref.dtype)


def _prenorm_streaming(x, a, gamma, beta, w, b, budget):
    n, cx, l = x.shape
    _, ca, _ = a.shape
    cout = w.shape[0]

    # Pad L up to a 128-multiple (lane-dense tiles, no monolithic full-L block).
    l_pad = ((l + 127) // 128) * 128
    if l_pad != l:
        pad = [(0, 0), (0, 0), (0, l_pad - l)]
        x_p, a_p = jnp.pad(x, pad), jnp.pad(a, pad)
    else:
        x_p, a_p = x, a

    bytes_per_col = (cx + ca + cout) * 4
    tile_l = _choose_tile_l(l_pad, bytes_per_col, budget // 2)
    vmem_limit = _scoped_vmem_limit(2 * bytes_per_col * tile_l, budget)

    # ---- Pass 1: per-sample partial stats, combined in the wrapper ----
    c, s, ssq = _bn_partial_stats(x_p, tile_l, l, vmem_limit)
    count = float(l)                                   # valid columns per n
    mean_n = c + s / count                             # (N, Cx, 1)
    m2_n = ssq - (s * s) / count                       # sum (x - mean_n)^2
    mean = jnp.mean(mean_n, axis=0)                    # (Cx, 1)
    m2 = jnp.sum(m2_n, axis=0) + count * jnp.sum((mean_n - mean) ** 2, axis=0)
    var = m2 / (n * count)                             # biased, per PyTorch
    inv_std = lax.rsqrt(var + _EPS)
    scale = gamma.reshape(cx, 1) * inv_std
    shift = beta.reshape(cx, 1) - mean * scale

    # Fold BN affine into the conv: tiny (Cout, Cx) ops in the wrapper, so the
    # streamed kernel does no per-element affine work.
    w_x = w[:, :cx]
    w_a = w[:, cx:]
    w_x_eff = w_x * scale.reshape(1, cx)
    b_eff = b.reshape(cout, 1) + w_x @ shift

    # ---- Pass 2: fused normalize (folded) + implicit concat + 1x1 conv ----
    grid = (n, l_pad // tile_l)
    tile_map = lambda n_i, l_i: (n_i, 0, l_i)
    const = lambda n_i, l_i: (0, 0)
    out = pl.pallas_call(
        _apply_kernel,
        out_shape=jax.ShapeDtypeStruct((n, cout, l_pad), jnp.float32),
        grid_spec=pltpu.PrefetchScalarGridSpec(
            num_scalar_prefetch=0,
            grid=grid,
            in_specs=[
                pl.BlockSpec((None, cx, tile_l), tile_map),
                pl.BlockSpec((None, ca, tile_l), tile_map),
                pl.BlockSpec((cout, cx), const),
                pl.BlockSpec((cout, ca), const),
                pl.BlockSpec((cout, 1), const),
            ],
            out_specs=pl.BlockSpec((None, cout, tile_l), tile_map),
        ),
        compiler_params=pltpu.CompilerParams(
            dimension_semantics=("parallel", "parallel"),
            vmem_limit_bytes=vmem_limit,
        ),
    )(x_p, a_p, w_x_eff, w_a, b_eff)

    if l_pad != l:
        out = out[:, :, :l]
    return out


# ---------------------------------------------------------------------------
# Top-level dispatch.
# ---------------------------------------------------------------------------
def prenorm_conv1x1(x, a, gamma, beta, w, b, *, force_streaming=False):
    """PreNorm with fn = 1x1 Conv1d, fully fused (concat never hits HBM)."""
    n, cx, l = x.shape
    _, ca, _ = a.shape
    cout = w.shape[0]
    assert w.shape[1] == cx + ca, (w.shape, cx, ca)

    budget = _vmem_budget_bytes()
    resident_bytes = 4 * n * l * (cx + ca + cout) + 4096
    if (not force_streaming) and (2 * resident_bytes + 16 * _MIB <= budget):
        vmem_limit = _scoped_vmem_limit(resident_bytes, budget)
        return _prenorm_fused_resident(x, a, gamma, beta, w, b, vmem_limit)
    return _prenorm_streaming(x, a, gamma, beta, w, b, budget)


def prenorm_forward(x, a, gamma, beta, w, b, *, force_streaming=False):
    # TODO(synk): arbitrary user `fn` (non-1x1-conv) would require
    # materializing concat(BN(x), a); this fused path covers the demo fn.
    return prenorm_conv1x1(x, a, gamma, beta, w, b,
                           force_streaming=force_streaming)


# ---------------------------------------------------------------------------
# Pure-JAX reference for correctness checking.
# ---------------------------------------------------------------------------
def _reference(x, a, gamma, beta, w, b):
    mean = jnp.mean(x, axis=(0, 2), keepdims=True)
    var = jnp.mean((x - mean) ** 2, axis=(0, 2), keepdims=True)
    y = (x - mean) / jnp.sqrt(var + _EPS) * gamma.reshape(1, -1, 1) \
        + beta.reshape(1, -1, 1)
    cat = jnp.concatenate([y, a], axis=1)
    return jnp.einsum("oc,ncl->nol", w, cat) + b.reshape(1, -1, 1)


def _check(x, a, gamma, beta, w, b, force_streaming, label):
    out = prenorm_forward(x, a, gamma, beta, w, b,
                          force_streaming=force_streaming)
    out = jax.block_until_ready(out)
    ref = _reference(x, a, gamma, beta, w, b)
    assert out.shape == ref.shape, (label, out.shape, ref.shape)
    err = float(jnp.max(jnp.abs(out - ref)))
    assert jnp.allclose(out, ref, atol=1e-4, rtol=1e-4), f"{label}: {err}"


if __name__ == "__main__":
    key = jax.random.PRNGKey(0)
    k_x, k_a, k_w, k_b, k_g, k_be, k_x2, k_a2 = jax.random.split(key, 8)

    # x: (N, dim, L), a: (N, ca, L).
    N, DIM, CA, L = 2, 4, 4, 1024
    COUT = 8

    x = jax.random.normal(k_x, (N, DIM, L), dtype=jnp.float32)
    a = jax.random.normal(k_a, (N, CA, L), dtype=jnp.float32)

    # BatchNorm1d affine params (perturbed from the PyTorch init so the
    # affine path is actually exercised).
    gamma = 1.0 + 0.1 * jax.random.normal(k_g, (DIM,), dtype=jnp.float32)
    beta = 0.1 * jax.random.normal(k_be, (DIM,), dtype=jnp.float32)

    # Demo `fn`: 1x1 Conv1d over the DIM + CA concatenated channels.
    w = jax.random.normal(k_w, (COUT, DIM + CA), dtype=jnp.float32) * 0.1
    b = jax.random.normal(k_b, (COUT,), dtype=jnp.float32) * 0.1

    # 1) Auto-selected path (resident single-pass at these small shapes).
    _check(x, a, gamma, beta, w, b, False, "resident")

    # 2) Streaming two-pass path (128-aligned L).
    _check(x, a, gamma, beta, w, b, True, "streaming")

    # 3) Streaming two-pass path with non-128-multiple L (pad + mask path).
    L2 = 200
    x2 = jax.random.normal(k_x2, (N, DIM, L2), dtype=jnp.float32) + 3.0
    a2 = jax.random.normal(k_a2, (N, CA, L2), dtype=jnp.float32)
    _check(x2, a2, gamma, beta, w, b, True, "streaming-masked")

    print("KERNEL_OK")
</pallas_src>

<mosaic_0001>
module attributes {stable_mosaic.version = 11 : i64} {
  func.func @_fused_resident_kernel(%arg0: i32, %arg1: memref<2x4x1024xf32, #tpu.memory_space<vmem>>, %arg2: memref<2x4x1024xf32, #tpu.memory_space<vmem>>, %arg3: memref<4x1xf32, #tpu.memory_space<vmem>>, %arg4: memref<4x1xf32, #tpu.memory_space<vmem>>, %arg5: memref<8x4xf32, #tpu.memory_space<vmem>>, %arg6: memref<8x4xf32, #tpu.memory_space<vmem>>, %arg7: memref<8x1xf32, #tpu.memory_space<vmem>>, %arg8: memref<2x8x1024xf32, #tpu.memory_space<vmem>>) attributes {dimension_semantics = [#tpu.dimension_semantics<arbitrary>], iteration_bounds = array<i64: 1>, scalar_prefetch = 0 : i64, scratch_operands = 0 : i64, tpu.core_type = #tpu.core_type<tc>, window_params = [{pipeline_mode = #tpu.pipeline_mode<synchronous>, transform_indices = @transform_0, window_bounds = array<i64: 2, 4, 1024>}, {pipeline_mode = #tpu.pipeline_mode<synchronous>, transform_indices = @transform_1, window_bounds = array<i64: 2, 4, 1024>}, {pipeline_mode = #tpu.pipeline_mode<synchronous>, transform_indices = @transform_2, window_bounds = array<i64: 4, 1>}, {pipeline_mode = #tpu.pipeline_mode<synchronous>, transform_indices = @transform_3, window_bounds = array<i64: 4, 1>}, {pipeline_mode = #tpu.pipeline_mode<synchronous>, transform_indices = @transform_4, window_bounds = array<i64: 8, 4>}, {pipeline_mode = #tpu.pipeline_mode<synchronous>, transform_indices = @transform_5, window_bounds = array<i64: 8, 4>}, {pipeline_mode = #tpu.pipeline_mode<synchronous>, transform_indices = @transform_6, window_bounds = array<i64: 8, 1>}, {pipeline_mode = #tpu.pipeline_mode<synchronous>, transform_indices = @transform_7, window_bounds = array<i64: 2, 8, 1024>}]} {
    %c0 = arith.constant 0 : index
    %c0_0 = arith.constant 0 : index
    %c0_1 = arith.constant 0 : index
    %0 = vector.load %arg1[%c0, %c0_0, %c0_1] : memref<2x4x1024xf32, #tpu.memory_space<vmem>>, vector<2x4x1024xf32>
    %cst = arith.constant dense<0.000000e+00> : vector<2x4xf32>
    %1 = vector.multi_reduction <add>, %0, %cst [2] : vector<2x4x1024xf32> to vector<2x4xf32>
    %2 = vector.shape_cast %1 : vector<2x4xf32> to vector<2x4x1xf32>
    %cst_2 = arith.constant dense<0.000000e+00> : vector<4x1xf32>
    %3 = vector.multi_reduction <add>, %2, %cst_2 [0] : vector<2x4x1xf32> to vector<4x1xf32>
    %4 = vector.shape_cast %3 : vector<4x1xf32> to vector<1x4x1xf32>
    %cst_3 = arith.constant 2.048000e+03 : f32
    %5 = vector.broadcast %cst_3 : f32 to vector<1x4x1xf32>
    %6 = arith.divf %4, %5 : vector<1x4x1xf32>
    %7 = vector.broadcast %6 : vector<1x4x1xf32> to vector<2x4x1024xf32>
    %8 = arith.subf %0, %7 : vector<2x4x1024xf32>
    %9 = arith.mulf %8, %8 : vector<2x4x1024xf32>
    %cst_4 = arith.constant dense<0.000000e+00> : vector<2x4xf32>
    %10 = vector.multi_reduction <add>, %9, %cst_4 [2] : vector<2x4x1024xf32> to vector<2x4xf32>
    %11 = vector.shape_cast %10 : vector<2x4xf32> to vector<2x4x1xf32>
    %cst_5 = arith.constant dense<0.000000e+00> : vector<4x1xf32>
    %12 = vector.multi_reduction <add>, %11, %cst_5 [0] : vector<2x4x1xf32> to vector<4x1xf32>
    %13 = vector.shape_cast %12 : vector<4x1xf32> to vector<1x4x1xf32>
    %cst_6 = arith.constant 2.048000e+03 : f32
    %14 = vector.broadcast %cst_6 : f32 to vector<1x4x1xf32>
    %15 = arith.divf %13, %14 : vector<1x4x1xf32>
    %cst_7 = arith.constant 9.99999974E-6 : f32
    %16 = vector.broadcast %cst_7 : f32 to vector<1x4x1xf32>
    %17 = arith.addf %15, %16 : vector<1x4x1xf32>
    %18 = math.rsqrt %17 : vector<1x4x1xf32>
    %c0_8 = arith.constant 0 : index
    %c0_9 = arith.constant 0 : index
    %19 = vector.load %arg3[%c0_8, %c0_9] : memref<4x1xf32, #tpu.memory_space<vmem>>, vector<4x1xf32>
    %20 = vector.shape_cast %19 : vector<4x1xf32> to vector<1x4x1xf32>
    %21 = arith.mulf %20, %18 : vector<1x4x1xf32>
    %c0_10 = arith.constant 0 : index
    %c0_11 = arith.constant 0 : index
    %22 = vector.load %arg4[%c0_10, %c0_11] : memref<4x1xf32, #tpu.memory_space<vmem>>, vector<4x1xf32>
    %23 = vector.shape_cast %22 : vector<4x1xf32> to vector<1x4x1xf32>
    %24 = arith.mulf %6, %21 : vector<1x4x1xf32>
    %25 = arith.subf %23, %24 : vector<1x4x1xf32>
    %26 = vector.broadcast %21 : vector<1x4x1xf32> to vector<2x4x1024xf32>
    %27 = arith.mulf %0, %26 : vector<2x4x1024xf32>
    %28 = vector.broadcast %25 : vector<1x4x1xf32> to vector<2x4x1024xf32>
    %29 = arith.addf %27, %28 : vector<2x4x1024xf32>
    %c0_12 = arith.constant 0 : index
    %c0_13 = arith.constant 0 : index
    %30 = vector.load %arg5[%c0_12, %c0_13] : memref<8x4xf32, #tpu.memory_space<vmem>>, vector<8x4xf32>
    %c0_14 = arith.constant 0 : index
    %c0_15 = arith.constant 0 : index
    %31 = vector.load %arg6[%c0_14, %c0_15] : memref<8x4xf32, #tpu.memory_space<vmem>>, vector<8x4xf32>
    %c0_16 = arith.constant 0 : index
    %c0_17 = arith.constant 0 : index
    %32 = vector.load %arg7[%c0_16, %c0_17] : memref<8x1xf32, #tpu.memory_space<vmem>>, vector<8x1xf32>
    %33 = vector.extract_strided_slice %29 {offsets = [0, 0, 0], sizes = [1, 4, 1024], strides = [1, 1, 1]} : vector<2x4x1024xf32> to vector<1x4x1024xf32>
    %34 = vector.shape_cast %33 : vector<1x4x1024xf32> to vector<4x1024xf32>
    %cst_18 = arith.constant dense<0.000000e+00> : vector<8x1024xf32>
    %35 = tpu.matmul %30, %34, %cst_18 {dimension_numbers = #tpu.dot_dimension_numbers<[1], [0], [0], [1], [0, 0, 1, 1], [], []>} : vector<8x4xf32>, vector<4x1024xf32>, vector<8x1024xf32> -> vector<8x1024xf32>
    %c0_19 = arith.constant 0 : index
    %c0_20 = arith.constant 0 : index
    %c0_21 = arith.constant 0 : index
    %36 = vector.load %arg2[%c0_19, %c0_20, %c0_21] : memref<2x4x1024xf32, #tpu.memory_space<vmem>>, vector<1x4x1024xf32>
    %37 = vector.shape_cast %36 : vector<1x4x1024xf32> to vector<4x1024xf32>
    %cst_22 = arith.constant dense<0.000000e+00> : vector<8x1024xf32>
    %38 = tpu.matmul %31, %37, %cst_22 {dimension_numbers = #tpu.dot_dimension_numbers<[1], [0], [0], [1], [0, 0, 1, 1], [], []>} : vector<8x4xf32>, vector<4x1024xf32>, vector<8x1024xf32> -> vector<8x1024xf32>
    %39 = arith.addf %35, %38 : vector<8x1024xf32>
    %40 = vector.broadcast %32 : vector<8x1xf32> to vector<8x1024xf32>
    %41 = arith.addf %39, %40 : vector<8x1024xf32>
    %c0_23 = arith.constant 0 : index
    %c0_24 = arith.constant 0 : index
    %c0_25 = arith.constant 0 : index
    %42 = vector.load %arg8[%c0_23, %c0_24, %c0_25] : memref<2x8x1024xf32, #tpu.memory_space<vmem>>, vector<1x8x1024xf32>
    %43 = vector.shape_cast %42 : vector<1x8x1024xf32> to vector<8x1024xf32>
    %44 = vector.shape_cast %41 : vector<8x1024xf32> to vector<1x8x1024xf32>
    tpu.vector_store %arg8[%c0_23, %c0_24, %c0_25], %44 {strides = array<i32>} : memref<2x8x1024xf32, #tpu.memory_space<vmem>>, vector<1x8x1024xf32>,
    %45 = vector.extract_strided_slice %29 {offsets = [1, 0, 0], sizes = [1, 4, 1024], strides = [1, 1, 1]} : vector<2x4x1024xf32> to vector<1x4x1024xf32>
    %46 = vector.shape_cast %45 : vector<1x4x1024xf32> to vector<4x1024xf32>
    %cst_26 = arith.constant dense<0.000000e+00> : vector<8x1024xf32>
    %47 = tpu.matmul %30, %46, %cst_26 {dimension_numbers = #tpu.dot_dimension_numbers<[1], [0], [0], [1], [0, 0, 1, 1], [], []>} : vector<8x4xf32>, vector<4x1024xf32>, vector<8x1024xf32> -> vector<8x1024xf32>
    %c1 = arith.constant 1 : index
    %c0_27 = arith.constant 0 : index
    %c0_28 = arith.constant 0 : index
    %48 = vector.load %arg2[%c1, %c0_27, %c0_28] : memref<2x4x1024xf32, #tpu.memory_space<vmem>>, vector<1x4x1024xf32>
    %49 = vector.shape_cast %48 : vector<1x4x1024xf32> to vector<4x1024xf32>
    %cst_29 = arith.constant dense<0.000000e+00> : vector<8x1024xf32>
    %50 = tpu.matmul %31, %49, %cst_29 {dimension_numbers = #tpu.dot_dimension_numbers<[1], [0], [0], [1], [0, 0, 1, 1], [], []>} : vector<8x4xf32>, vector<4x1024xf32>, vector<8x1024xf32> -> vector<8x1024xf32>
    %51 = arith.addf %47, %50 : vector<8x1024xf32>
    %52 = vector.broadcast %32 : vector<8x1xf32> to vector<8x1024xf32>
    %53 = arith.addf %51, %52 : vector<8x1024xf32>
    %c1_30 = arith.constant 1 : index
    %c0_31 = arith.constant 0 : index
    %c0_32 = arith.constant 0 : index
    %54 = vector.load %arg8[%c1_30, %c0_31, %c0_32] : memref<2x8x1024xf32, #tpu.memory_space<vmem>>, vector<1x8x1024xf32>
    %55 = vector.shape_cast %54 : vector<1x8x1024xf32> to vector<8x1024xf32>
    %56 = vector.shape_cast %53 : vector<8x1024xf32> to vector<1x8x1024xf32>
    tpu.vector_store %arg8[%c1_30, %c0_31, %c0_32], %56 {strides = array<i32>} : memref<2x8x1024xf32, #tpu.memory_space<vmem>>, vector<1x8x1024xf32>,
    return
  }
  func.func @transform_0(%arg0: i32) -> (i32, i32, i32) {
    %c0_i32 = arith.constant 0 : i32
    %c0_i32_0 = arith.constant 0 : i32
    %c0_i32_1 = arith.constant 0 : i32
    %c0_i32_2 = arith.constant 0 : i32
    return %c0_i32, %c0_i32_0, %c0_i32_1 : i32, i32, i32
  }
  func.func @transform_1(%arg0: i32) -> (i32, i32, i32) {
    %c0_i32 = arith.constant 0 : i32
    %c0_i32_0 = arith.constant 0 : i32
    %c0_i32_1 = arith.constant 0 : i32
    %c0_i32_2 = arith.constant 0 : i32
    return %c0_i32, %c0_i32_0, %c0_i32_1 : i32, i32, i32
  }
  func.func @transform_2(%arg0: i32) -> (i32, i32) {
    %c0_i32 = arith.constant 0 : i32
    %c0_i32_0 = arith.constant 0 : i32
    %c0_i32_1 = arith.constant 0 : i32
    return %c0_i32, %c0_i32_0 : i32, i32
  }
  func.func @transform_3(%arg0: i32) -> (i32, i32) {
    %c0_i32 = arith.constant 0 : i32
    %c0_i32_0 = arith.constant 0 : i32
    %c0_i32_1 = arith.constant 0 : i32
    return %c0_i32, %c0_i32_0 : i32, i32
  }
  func.func @transform_4(%arg0: i32) -> (i32, i32) {
    %c0_i32 = arith.constant 0 : i32
    %c0_i32_0 = arith.constant 0 : i32
    %c0_i32_1 = arith.constant 0 : i32
    return %c0_i32, %c0_i32_0 : i32, i32
  }
  func.func @transform_5(%arg0: i32) -> (i32, i32) {
    %c0_i32 = arith.constant 0 : i32
    %c0_i32_0 = arith.constant 0 : i32
    %c0_i32_1 = arith.constant 0 : i32
    return %c0_i32, %c0_i32_0 : i32, i32
  }
  func.func @transform_6(%arg0: i32) -> (i32, i32) {
    %c0_i32 = arith.constant 0 : i32
    %c0_i32_0 = arith.constant 0 : i32
    %c0_i32_1 = arith.constant 0 : i32
    return %c0_i32, %c0_i32_0 : i32, i32
  }
  func.func @transform_7(%arg0: i32) -> (i32, i32, i32) {
    %c0_i32 = arith.constant 0 : i32
    %c0_i32_0 = arith.constant 0 : i32
    %c0_i32_1 = arith.constant 0 : i32
    %c0_i32_2 = arith.constant 0 : i32
    return %c0_i32, %c0_i32_0, %c0_i32_1 : i32, i32, i32
  }
}

</mosaic_0001>

<bundles_post_ra>
// kernel: tpu_custom_call.1
= control target key start
LH: loop header
LB: loop body
LE: loop exit
PB: predicated region body
PF: predicated region fallthrough
CT: control target
= control target key end

     0   :  { %12 = vsyncpa [#allocation3], 0  ;;  %s1621_s0 = inlined_call_operand.hbm [shape: f32[2,4,1024], index: 0, kind: input, shape index: {}]   ;;  %s1622_s1 = inlined_call_operand.hbm [shape: f32[2,4,1024], index: 1, kind: input, shape index: {}]   ;;  %s1623_s2 = inlined_call_operand.vmem [shape: f32[4,1], index: 2, kind: input, shape index: {}]   ;;  %s1624_s3 = inlined_call_operand.vmem [shape: f32[4,1], index: 3, kind: input, shape index: {}]   ;;  %s1625_s4 = inlined_call_operand.vmem [shape: f32[8,4], index: 4, kind: input, shape index: {}]   ;;  %s1626_s5 = inlined_call_operand.vmem [shape: f32[8,4], index: 5, kind: input, shape index: {}]   ;;  %s1627_s6 = inlined_call_operand.vmem [shape: f32[8,1], index: 6, kind: input, shape index: {}]   ;;  %s1628_s7 = inlined_call_operand.hbm [shape: f32[2,8,1024], index: 7, kind: output, shape index: {}]  }
   0x1   :  { %13 = vsyncpa [#allocation6], 0 }
   0x2   :  { %14 = vsyncpa [#allocation4], 0  ;;  %s19_s26 = sshll.u32 %s1621_s0, 4  ;;  %s1340_s27 = smov [#allocation2]   ;;  %s20_s26 = int_to_ptr.hbm [resolvable:$true] %s19_s26 }
   0x3   :  { %s21_s28 = sshll.u32 %s1340_s27, 4  ;;  %s32_s8 = sshll.u32 %s1622_s1, 4  ;;  %s22_s28 = int_to_ptr.vmem [resolvable:$true] %s21_s28  ;;  %s33_s8 = int_to_ptr.hbm [resolvable:$true] %s32_s8 }
   0x4   :  { %s1341_s9 = smov 512   ;;  %s1342_s10 = smov 32  }
   0x5   :  { %27 = dma.hbm_to_vmem [thread:$0]  %s20_s26, 1024, %s22_s28, [#allocation3], %s1341_s9, %s1341_s9, %s1342_s10  }
   0x6   :  { %s1343_s11 = smov [#allocation5]  }
   0x7   :  { %s34_s12 = sshll.u32 %s1343_s11, 4  ;;  %s35_s12 = int_to_ptr.vmem [resolvable:$true] %s34_s12 }
   0x8   :  { %40 = dma.hbm_to_vmem [thread:$0]  %s33_s8, 1024, %s35_s12, [#allocation6], %s1341_s9, %s1341_s9, %s1342_s10  }
   0x9   :  { %1334 = dma.done.wait [#allocation3], 1024  }
   0xa   :  { %1335 = vsyncadd [#allocation3], 4294966272 }
   0xb   :  { %1336 = dma.done.wait [#allocation6], 1024  }
   0xc   :  { %1337 = vsyncadd [#allocation6], 4294966272  ;;  %v1396_v0 = vld [vmem:[#allocation2] sm:$0xff]  ;;  %v1398_v1 = vld [vmem:[#allocation2 + $0x8] sm:$0xff]  ;;  %vm118_vm0 = vcmask 1043456   ;;  %v1344_v54 = vmov 2048.0  }
   0xd   :  { %v1400_v2 = vld [vmem:[#allocation2 + $0x10] sm:$0xff]  ;;  %v1402_v3 = vld [vmem:[#allocation2 + $0x18] sm:$0xff]  ;;  %75 = vst [vmem:[#allocation1] ss:$2 sm:$0xff] %v1396_v0  ;;  %v1408_v4 = vld [vmem:[#allocation2 + $0x28] sm:$0xff]  ;;  %1258 = vrcp.f32 %v1344_v54  ;;  %vm351_vm5 = vcmask 31744  }
   0xe   :  { %77 = vst [vmem:[#allocation1 + $0x10] ss:$2 sm:$0xff] %v1398_v1  ;;  %v1410_v5 = vld [vmem:[#allocation2 + $0x30] sm:$0xff]  ;;  %v1412_v8 = vld [vmem:[#allocation2 + $0x38] sm:$0xff]  ;;  %v1414_v15 = vld [vmem:[#allocation2 + $0x20] sm:$0xff]  ;;  %s1168_s20 = sshll.u32 %s1628_s7, 4  ;;  %s1169_s20 = int_to_ptr.hbm [resolvable:$true] %s1168_s20 }
   0xf   :  { %79 = vst [vmem:[#allocation1 + $0x20] ss:$2 sm:$0xff] %v1400_v2  ;;  %v1345_v61 = vmov 839922192   ;;  %s1348_s21 = smov 1024   ;;  %s1349_s22 = smov 64  }
  0x10   :  { %81 = vst [vmem:[#allocation1 + $0x30] ss:$2 sm:$0xff] %v1402_v3  ;;  %v166_v62 = vunpack.c.l.s4 %v1345_v61 }
  0x13   :  { %v1259_v55 = vpop.eup %1258 }
  0x14   :  { %v82_v6 = vld.sshfl [vmem:[#allocation1] sm:$0xff pattern:$0x75316420]  ;;  %v83_v7 = vld.sshfl [vmem:[#allocation1 + $0x8] sm:$0xff pattern:$0x75316420]  ;;  %vm161_vm1 = vweird.f32 %v1259_v55 }
  0x15   :  { %v84_v9 = vld.sshfl [vmem:[#allocation1 + $0x10] sm:$0xff pattern:$0x75316420]  ;;  %v85_v10 = vld.sshfl [vmem:[#allocation1 + $0x18] sm:$0xff pattern:$0x75316420] }
  0x16   :  { %v86_v11 = vld.sshfl [vmem:[#allocation1 + $0x20] sm:$0xff pattern:$0x75316420]  ;;  %v87_v12 = vld.sshfl [vmem:[#allocation1 + $0x28] sm:$0xff pattern:$0x75316420] }
  0x17   :  { %v88_v13 = vld.sshfl [vmem:[#allocation1 + $0x30] sm:$0xff pattern:$0x75316420]  ;;  %v89_v14 = vld.sshfl [vmem:[#allocation1 + $0x38] sm:$0xff pattern:$0x75316420] }
  0x18   :  { %91 = vst [vmem:[#allocation1 + $0x10] ss:$2 sm:$0xff] %v1408_v4  ;;  %v119_v16 = vsel %vm118_vm0, %v82_v6, 0.0  ;;  %v120_v17 = vsel %vm118_vm0, %v83_v7, 0.0  ;;  %v122_v18 = vsel %vm118_vm0, %v84_v9, 0.0  ;;  %v124_v20 = vsel %vm118_vm0, %v85_v10, 0.0 }
  0x19   :  { %92 = vst [vmem:[#allocation1 + $0x20] ss:$2 sm:$0xff] %v1410_v5  ;;  %v121_v19 = vadd.f32 %v120_v17, %v119_v16  ;;  %v126_v22 = vsel %vm118_vm0, %v86_v11, 0.0  ;;  %v128_v24 = vsel %vm118_vm0, %v87_v12, 0.0  ;;  %v130_v26 = vsel %vm118_vm0, %v88_v13, 0.0 }
  0x1a   :  { %93 = vst [vmem:[#allocation1 + $0x30] ss:$2 sm:$0xff] %v1412_v8  ;;  %v132_v29 = vsel %vm118_vm0, %v89_v14, 0.0  ;;  %v157_v56 = vmul.f32 2048.0, %v1259_v55  ;;  %v1440_v10 = vunpack.c.0.s8 %v166_v62 }
  0x1b   :  { %v123_v21 = vadd.f32 %v122_v18, %v121_v19  ;;  %90 = vst [vmem:[#allocation1] ss:$2 sm:$0xff] %v1414_v15 }
  0x1c   :  { %v158_v57 = vsub.f32 1.0, %v157_v56 }
  0x1d   :  { %v125_v23 = vadd.f32 %v124_v20, %v123_v21 }
  0x1e   :  { %v159_v59 = vmul.f32 %v1259_v55, %v158_v57 }
  0x1f   :  { %v127_v25 = vadd.f32 %v126_v22, %v125_v23  ;;  %v96_v27 = vld.sshfl [vmem:[#allocation1 + $0x10] sm:$0xff pattern:$0x75316420]  ;;  %v97_v30 = vld.sshfl [vmem:[#allocation1 + $0x18] sm:$0xff pattern:$0x75316420] }
  0x20   :  { %v139_v36 = vsel %vm118_vm0, %v96_v27, 0.0  ;;  %v98_v37 = vld.sshfl [vmem:[#allocation1 + $0x20] sm:$0xff pattern:$0x75316420]  ;;  %v141_v40 = vsel %vm118_vm0, %v97_v30, 0.0  ;;  %v160_v60 = vadd.f32 %v1259_v55, %v159_v59 }
  0x21   :  { %v129_v28 = vadd.f32 %v128_v24, %v127_v25  ;;  %v99_v41 = vld.sshfl [vmem:[#allocation1 + $0x28] sm:$0xff pattern:$0x75316420]  ;;  %v143_v43 = vsel %vm118_vm0, %v98_v37, 0.0 }
  0x22   :  { %v94_v31 = vld.sshfl [vmem:[#allocation1] sm:$0xff pattern:$0x75316420]  ;;  %v95_v32 = vld.sshfl [vmem:[#allocation1 + $0x8] sm:$0xff pattern:$0x75316420]  ;;  %v1437_v7 = vsel %vm161_vm1, %v1259_v55, %v160_v60 }
  0x23   :  { %v131_v33 = vadd.f32 %v130_v26, %v129_v28  ;;  %v136_v34 = vsel %vm118_vm0, %v94_v31, 0.0  ;;  %v137_v35 = vsel %vm118_vm0, %v95_v32, 0.0  ;;  %v100_v44 = vld.sshfl [vmem:[#allocation1 + $0x30] sm:$0xff pattern:$0x75316420]  ;;  %v145_v46 = vsel %vm118_vm0, %v99_v41, 0.0 }
  0x24   :  { %v138_v38 = vadd.f32 %v137_v35, %v136_v34  ;;  %v101_v47 = vld.sshfl [vmem:[#allocation1 + $0x38] sm:$0xff pattern:$0x75316420]  ;;  %v147_v49 = vsel %vm118_vm0, %v100_v44, 0.0 }
  0x25   :  { %v133_v39 = vadd.f32 %v132_v29, %v131_v33  ;;  %v149_v51 = vsel %vm118_vm0, %v101_v47, 0.0 }
  0x26   :  { %v140_v42 = vadd.f32 %v139_v36, %v138_v38 }
  0x27   :  { %134 = vadd.xlane.f32.xlu0 %v133_v39 }
  0x28   :  { %v142_v45 = vadd.f32 %v141_v40, %v140_v42 }
  0x2a   :  { %v144_v48 = vadd.f32 %v143_v43, %v142_v45 }
  0x2c   :  { %v146_v50 = vadd.f32 %v145_v46, %v144_v48 }
  0x2e   :  { %v148_v52 = vadd.f32 %v147_v49, %v146_v50 }
  0x30   :  { %v150_v53 = vadd.f32 %v149_v51, %v148_v52 }
  0x32   :  { %151 = vadd.xlane.f32.xlu0 %v150_v53 }
  0x9a   :  { %v135_v58 = vpop.xlane.xlu0 %134 }
  0x9b   :  { %v153_v6 = vsel %vm118_vm0, %v135_v58, 0.0 }
  0xa5   :  { %v152_v63 = vpop.xlane.xlu0 %151 }
  0xa6   :  { %v154_v9 = vsel %vm118_vm0, %v152_v63, 0.0 }
  0xa7   :  { %v155_v11 = vadd.f32 %v154_v9, %v153_v6 }
  0xa9   :  { %v1443_v12 = vmul.f32 %v1437_v7, %v155_v11 }
  0xab   :  { %v168_v13 = vperm.slane %v1443_v12, %v1440_v10 }
  0xad   :  { %v170_v14 = vsub.f32 %v1396_v0, %v168_v13  ;;  %v171_v16 = vsub.f32 %v1398_v1, %v168_v13  ;;  %v172_v17 = vsub.f32 %v1400_v2, %v168_v13  ;;  %v173_v18 = vsub.f32 %v1402_v3, %v168_v13 }
  0xae   :  { %v175_v23 = vsub.f32 %v1408_v4, %v168_v13  ;;  %v176_v24 = vsub.f32 %v1410_v5, %v168_v13  ;;  %v177_v25 = vsub.f32 %v1412_v8, %v168_v13  ;;  %v174_v28 = vsub.f32 %v1414_v15, %v168_v13 }
  0xaf   :  { %v178_v19 = vmul.f32 %v170_v14, %v170_v14  ;;  %v179_v20 = vmul.f32 %v171_v16, %v171_v16  ;;  %v180_v21 = vmul.f32 %v172_v17, %v172_v17  ;;  %v181_v22 = vmul.f32 %v173_v18, %v173_v18 }
  0xb0   :  { %v183_v31 = vmul.f32 %v175_v23, %v175_v23  ;;  %v184_v34 = vmul.f32 %v176_v24, %v176_v24  ;;  %v185_v37 = vmul.f32 %v177_v25, %v177_v25  ;;  %v182_v40 = vmul.f32 %v174_v28, %v174_v28 }
  0xb1   :  { %194 = vst [vmem:[#allocation1] ss:$2 sm:$0xff] %v178_v19  ;;  %v1346_v24 = vmov 0  }
  0xb2   :  { %196 = vst [vmem:[#allocation1 + $0x10] ss:$2 sm:$0xff] %v179_v20  ;;  %1256 = vset.pattern.permute.xlu2 %v1346_v24  ;;  %1257 = vset.pattern.permute.xlu0 %v1346_v24 }
  0xb3   :  { %198 = vst [vmem:[#allocation1 + $0x20] ss:$2 sm:$0xff] %v180_v21 }
  0xb4   :  { %200 = vst [vmem:[#allocation1 + $0x30] ss:$2 sm:$0xff] %v181_v22 }
  0xb8   :  { %v201_v26 = vld.sshfl [vmem:[#allocation1] sm:$0xff pattern:$0x75316420]  ;;  %v202_v27 = vld.sshfl [vmem:[#allocation1 + $0x8] sm:$0xff pattern:$0x75316420] }
  0xb9   :  { %v203_v29 = vld.sshfl [vmem:[#allocation1 + $0x10] sm:$0xff pattern:$0x75316420]  ;;  %v204_v30 = vld.sshfl [vmem:[#allocation1 + $0x18] sm:$0xff pattern:$0x75316420] }
  0xba   :  { %v205_v32 = vld.sshfl [vmem:[#allocation1 + $0x20] sm:$0xff pattern:$0x75316420]  ;;  %v206_v33 = vld.sshfl [vmem:[#allocation1 + $0x28] sm:$0xff pattern:$0x75316420] }
  0xbb   :  { %v207_v35 = vld.sshfl [vmem:[#allocation1 + $0x30] sm:$0xff pattern:$0x75316420]  ;;  %v208_v36 = vld.sshfl [vmem:[#allocation1 + $0x38] sm:$0xff pattern:$0x75316420] }
  0xbc   :  { %210 = vst [vmem:[#allocation1 + $0x10] ss:$2 sm:$0xff] %v183_v31  ;;  %v237_v38 = vsel %vm118_vm0, %v201_v26, 0.0  ;;  %v238_v39 = vsel %vm118_vm0, %v202_v27, 0.0  ;;  %v240_v42 = vsel %vm118_vm0, %v203_v29, 0.0  ;;  %v242_v44 = vsel %vm118_vm0, %v204_v30, 0.0 }
  0xbd   :  { %211 = vst [vmem:[#allocation1 + $0x20] ss:$2 sm:$0xff] %v184_v34  ;;  %v239_v41 = vadd.f32 %v238_v39, %v237_v38  ;;  %v244_v46 = vsel %vm118_vm0, %v205_v32, 0.0  ;;  %v246_v48 = vsel %vm118_vm0, %v206_v33, 0.0  ;;  %v248_v50 = vsel %vm118_vm0, %v207_v35, 0.0 }
  0xbe   :  { %212 = vst [vmem:[#allocation1 + $0x30] ss:$2 sm:$0xff] %v185_v37  ;;  %v250_v57 = vsel %vm118_vm0, %v208_v36, 0.0  ;;  %v286_v38 = vld [vmem:[%s1623_s2] sm:$0xf] }
  0xbf   :  { %v241_v43 = vadd.f32 %v240_v42, %v239_v41  ;;  %209 = vst [vmem:[#allocation1] ss:$2 sm:$0xff] %v182_v40  ;;  %v288_v41 = vld [vmem:[%s1624_s3] sm:$0xf] }
  0xc1   :  { %v243_v45 = vadd.f32 %v242_v44, %v241_v43  ;;  %v328_v43 = vld [vmem:[#allocation5] sm:$0xff]  ;;  %v329_v44 = vld [vmem:[#allocation5 + $0x8] sm:$0xff] }
  0xc3   :  { %v245_v47 = vadd.f32 %v244_v46, %v243_v45  ;;  %v215_v51 = vld.sshfl [vmem:[#allocation1 + $0x10] sm:$0xff pattern:$0x75316420]  ;;  %v216_v58 = vld.sshfl [vmem:[#allocation1 + $0x18] sm:$0xff pattern:$0x75316420] }
  0xc4   :  { %v257_v61 = vsel %vm118_vm0, %v215_v51, 0.0  ;;  %v217_v62 = vld.sshfl [vmem:[#allocation1 + $0x20] sm:$0xff pattern:$0x75316420]  ;;  %v259_v6 = vsel %vm118_vm0, %v216_v58, 0.0 }
  0xc5   :  { %v247_v49 = vadd.f32 %v246_v48, %v245_v47  ;;  %v218_v9 = vld.sshfl [vmem:[#allocation1 + $0x28] sm:$0xff pattern:$0x75316420]  ;;  %v261_v13 = vsel %vm118_vm0, %v217_v62, 0.0  ;;  %338 = vst [vmem:[#allocation1 + $0x10] ss:$2 sm:$0xff] %v329_v44 }
  0xc6   :  { %v213_v52 = vld.sshfl [vmem:[#allocation1] sm:$0xff pattern:$0x75316420]  ;;  %v214_v53 = vld.sshfl [vmem:[#allocation1 + $0x8] sm:$0xff pattern:$0x75316420] }
  0xc7   :  { %v249_v54 = vadd.f32 %v248_v50, %v247_v49  ;;  %v254_v55 = vsel %vm118_vm0, %v213_v52, 0.0  ;;  %v255_v56 = vsel %vm118_vm0, %v214_v53, 0.0  ;;  %v219_v14 = vld.sshfl [vmem:[#allocation1 + $0x30] sm:$0xff pattern:$0x75316420]  ;;  %v263_v17 = vsel %vm118_vm0, %v218_v9, 0.0 }
  0xc8   :  { %v256_v59 = vadd.f32 %v255_v56, %v254_v55  ;;  %v220_v18 = vld.sshfl [vmem:[#allocation1 + $0x38] sm:$0xff pattern:$0x75316420]  ;;  %v265_v20 = vsel %vm118_vm0, %v219_v14, 0.0  ;;  %336 = vst [vmem:[#allocation1] ss:$2 sm:$0xff] %v328_v43 }
  0xc9   :  { %v251_v60 = vadd.f32 %v250_v57, %v249_v54  ;;  %v267_v22 = vsel %vm118_vm0, %v220_v18, 0.0  ;;  %v1484_v45 = vld [vmem:[%s1626_s5] sm:$0xff]  ;;  %v330_v49 = vld [vmem:[#allocation5 + $0x10] sm:$0xff] }
  0xca   :  { %v258_v63 = vadd.f32 %v257_v61, %v256_v59  ;;  %v331_v50 = vld [vmem:[#allocation5 + $0x18] sm:$0xff]  ;;  %340 = vst [vmem:[#allocation1 + $0x20] ss:$2 sm:$0xff] %v330_v49 }
  0xcb   :  { %252 = vadd.xlane.f32.xlu1 %v251_v60  ;;  %342 = vst [vmem:[#allocation1 + $0x30] ss:$2 sm:$0xff] %v331_v50  ;;  %v327_v56 = vld [vmem:[%s1627_s6] sm:$0xff] }
  0xcc   :  { %v260_v11 = vadd.f32 %v259_v6, %v258_v63  ;;  %v346_v48 = vld.sshfl [vmem:[#allocation1 + $0x18] sm:$0xff pattern:$0x75316420]  ;;  %731 = vperm.xlu0 %1257, %v327_v56  }
  0xcd   :  { %1188 = vmatpush.msk.msra.mxu3 %vm118_vm0, %v346_v48 }
  0xce   :  { %v262_v16 = vadd.f32 %v261_v13, %v260_v11  ;;  %1189 = vmatmul.msk.f32.vlgmr.msra.gmra.mxu3 %vm351_vm5, %v1484_v45 }
  0xcf   :  { %v343_v46 = vld.sshfl [vmem:[#allocation1] sm:$0xff pattern:$0x75316420]  ;;  %v344_v47 = vld.sshfl [vmem:[#allocation1 + $0x8] sm:$0xff pattern:$0x75316420] }
  0xd0   :  { %v264_v19 = vadd.f32 %v263_v17, %v262_v16  ;;  %1182 = vmatpush.msk.msra.mxu0 %vm118_vm0, %v343_v46  ;;  %1184 = vmatpush.msk.msra.mxu1 %vm118_vm0, %v344_v47  ;;  %v752_v16 = vld [vmem:[#allocation5 + $0x28] sm:$0xff]  ;;  %v753_v17 = vld [vmem:[#allocation5 + $0x30] sm:$0xff] }
  0xd1   :  { %1183 = vmatmul.msk.f32.vlgmr.msra.gmra.mxu0 %vm351_vm5, %v1484_v45  ;;  %1185 = vmatmul.msk.f32.vlgmr.msra.gmra.mxu1 %vm351_vm5, %v1484_v45  ;;  %v347_v51 = vld.sshfl [vmem:[#allocation1 + $0x20] sm:$0xff pattern:$0x75316420]  ;;  %v348_v52 = vld.sshfl [vmem:[#allocation1 + $0x28] sm:$0xff pattern:$0x75316420] }
  0xd2   :  { %v266_v21 = vadd.f32 %v265_v20, %v264_v19  ;;  %1190 = vmatpush.msk.msrb.mxu0 %vm118_vm0, %v347_v51  ;;  %1192 = vmatpush.msk.msrb.mxu1 %vm118_vm0, %v348_v52  ;;  %v349_v53 = vld.sshfl [vmem:[#allocation1 + $0x30] sm:$0xff pattern:$0x75316420]  ;;  %v350_v54 = vld.sshfl [vmem:[#allocation1 + $0x38] sm:$0xff pattern:$0x75316420] }
  0xd3   :  { %1196 = vmatpush.msk.msrb.mxu3 %vm118_vm0, %v350_v54 }
  0xd4   :  { %v268_v23 = vadd.f32 %v267_v22, %v266_v21  ;;  %v754_v22 = vld [vmem:[#allocation5 + $0x38] sm:$0xff] }
  0xd6   :  { %269 = vadd.xlane.f32.xlu1 %v268_v23  ;;  %1197 = vmatmul.msk.f32.vlgmr.msrb.gmra.mxu3 %vm351_vm5, %v1484_v45 }
  0xd9   :  { %1191 = vmatmul.msk.f32.vlgmr.msrb.gmra.mxu0 %vm351_vm5, %v1484_v45  ;;  %1193 = vmatmul.msk.f32.vlgmr.msrb.gmra.mxu1 %vm351_vm5, %v1484_v45 }
 0x13e   :  { %v253_v25 = vpop.xlane.xlu1 %252  ;;  %v1600_v49 = vpop.permute.xlu0 %731 }
 0x13f   :  { %v271_v27 = vsel %vm118_vm0, %v253_v25, 0.0 }
 0x149   :  { %v270_v26 = vpop.xlane.xlu1 %269 }
 0x14a   :  { %v272_v28 = vsel %vm118_vm0, %v270_v26, 0.0 }
 0x14b   :  { %v273_v29 = vadd.f32 %v272_v28, %v271_v27 }
 0x14d   :  { %v274_v30 = vmul.f32 %v273_v29, %v1437_v7 }
 0x14e   :  { %v408_v43 = vpop.f32.mrf.mxu1 }
 0x14f   :  { %v275_v31 = vadd.f32 1e-05, %v274_v30 }
 0x151   :  { %1260 = vrsqrt.f32 %v275_v31  ;;  %vm282_vm3 = vweird.f32 %v275_v31 }
 0x156   :  { %v488_v47 = vpop.f32.mrf.mxu1 }
 0x157   :  { %v1261_v32 = vpop.eup %1260 }
 0x158   :  { %v277_v33 = vmul.f32 %v1261_v32, %v275_v31  ;;  %vm283_vm2 = vweird.f32 %v1261_v32 }
 0x159   :  { %vm284_vm4 = vmor %vm282_vm3, %vm283_vm2 }
 0x15a   :  { %v278_v34 = vmul.f32 %v1261_v32, %v277_v33 }
 0x15c   :  { %v279_v35 = vmul.f32 0.5, %v278_v34 }
 0x15e   :  { %v280_v36 = vsub.f32 1.5, %v279_v35 }
 0x160   :  { %v281_v37 = vmul.f32 %v1261_v32, %v280_v36 }
 0x162   :  { %v285_v39 = vsel %vm284_vm4, %v1261_v32, %v281_v37 }
 0x163   :  { %v287_v40 = vmul.f32 %v286_v38, %v285_v39 }
 0x165   :  { %293 = vperm.xlu2 %1256, %v287_v40   ;;  %v289_v7 = vmul.f32 %v287_v40, %v1443_v12  ;;  %v345_v12 = vld.sshfl [vmem:[#allocation1 + $0x10] sm:$0xff pattern:$0x75316420] }
 0x166   :  { %1186 = vmatpush.msk.msra.mxu2 %vm118_vm0, %v345_v12 }
 0x167   :  { %v290_v42 = vsub.f32 %v288_v41, %v289_v7  ;;  %1187 = vmatmul.msk.f32.vlgmr.msra.gmra.mxu2 %vm351_vm5, %v1484_v45 }
 0x168   :  { %1194 = vmatpush.msk.msrb.mxu2 %vm118_vm0, %v349_v53 }
 0x16d   :  { %310 = vperm.xlu2 %1256, %v290_v42   ;;  %v388_v42 = vpop.f32.mrf.mxu0 }
 0x16f   :  { %1195 = vmatmul.msk.f32.vlgmr.msrb.gmra.mxu2 %vm351_vm5, %v1484_v45 }
 0x175   :  { %v468_v46 = vpop.f32.mrf.mxu0 }
 0x1bf   :  { %v294_v55 = vpop.permute.xlu2 %293 }
 0x1c0   :  { %v298_v57 = vperm.slane %v294_v55, %v1440_v10 }
 0x1c2   :  { %v300_v59 = vmul.f32 %v298_v57, %v1396_v0  ;;  %v301_v60 = vmul.f32 %v298_v57, %v1398_v1  ;;  %v302_v61 = vmul.f32 %v298_v57, %v1400_v2  ;;  %v303_v63 = vmul.f32 %v298_v57, %v1402_v3  ;;  %v1522_v0 = vld [vmem:[%s1625_s4] sm:$0xff]  ;;  %v751_v1 = vld [vmem:[#allocation5 + $0x20] sm:$0xff]  ;;  %s1347_s4 = smov [#allocation7]  }
 0x1c3   :  { %v304_v23 = vmul.f32 %v298_v57, %v1414_v15  ;;  %v305_v24 = vmul.f32 %v298_v57, %v1408_v4  ;;  %v306_v26 = vmul.f32 %v298_v57, %v1410_v5  ;;  %v307_v15 = vmul.f32 %v298_v57, %v1412_v8  ;;  %s1166_s17 = sshll.u32 %s1347_s4, 4  ;;  %s1167_s17 = int_to_ptr.vmem [resolvable:$true] %s1166_s17 }
 0x1c7   :  { %v311_v58 = vpop.permute.xlu2 %310 }
 0x1c8   :  { %v315_v62 = vperm.slane %v311_v58, %v1440_v10 }
 0x1ca   :  { %v317_v6 = vadd.f32 %v315_v62, %v300_v59  ;;  %v318_v9 = vadd.f32 %v315_v62, %v301_v60  ;;  %v319_v11 = vadd.f32 %v315_v62, %v302_v61  ;;  %v320_v13 = vadd.f32 %v315_v62, %v303_v63 }
 0x1cb   :  { %v321_v25 = vadd.f32 %v315_v62, %v304_v23  ;;  %v322_v29 = vadd.f32 %v315_v62, %v305_v24  ;;  %v323_v5 = vadd.f32 %v315_v62, %v306_v26  ;;  %v324_v33 = vadd.f32 %v315_v62, %v307_v15 }
 0x1cc   :  { %535 = vst [vmem:[#allocation1] ss:$2 sm:$0xff] %v317_v6 }
 0x1cd   :  { %537 = vst [vmem:[#allocation1 + $0x10] ss:$2 sm:$0xff] %v318_v9 }
 0x1ce   :  { %539 = vst [vmem:[#allocation1 + $0x20] ss:$2 sm:$0xff] %v319_v11 }
 0x1cf   :  { %541 = vst [vmem:[#allocation1 + $0x30] ss:$2 sm:$0xff] %v320_v13 }
 0x1d3   :  { %v542_v14 = vld.sshfl [vmem:[#allocation1] sm:$0xff pattern:$0x75316420]  ;;  %v543_v2 = vld.sshfl [vmem:[#allocation1 + $0x8] sm:$0xff pattern:$0x75316420] }
 0x1d4   :  { %1198 = vmatpush.msk.msra.mxu0 %vm118_vm0, %v542_v14  ;;  %1200 = vmatpush.msk.msra.mxu1 %vm118_vm0, %v543_v2  ;;  %v544_v3 = vld.sshfl [vmem:[#allocation1 + $0x10] sm:$0xff pattern:$0x75316420]  ;;  %v545_v10 = vld.sshfl [vmem:[#allocation1 + $0x18] sm:$0xff pattern:$0x75316420] }
 0x1d5   :  { %1202 = vmatpush.msk.msra.mxu2 %vm118_vm0, %v544_v3  ;;  %1204 = vmatpush.msk.msra.mxu3 %vm118_vm0, %v545_v10  ;;  %v546_v18 = vld.sshfl [vmem:[#allocation1 + $0x20] sm:$0xff pattern:$0x75316420]  ;;  %v547_v19 = vld.sshfl [vmem:[#allocation1 + $0x28] sm:$0xff pattern:$0x75316420] }
 0x1d6   :  { %1199 = vmatmul.msk.f32.vlgmr.msra.gmra.mxu0 %vm351_vm5, %v1522_v0  ;;  %1201 = vmatmul.msk.f32.vlgmr.msra.gmra.mxu1 %vm351_vm5, %v1522_v0  ;;  %v548_v20 = vld.sshfl [vmem:[#allocation1 + $0x30] sm:$0xff pattern:$0x75316420]  ;;  %v549_v21 = vld.sshfl [vmem:[#allocation1 + $0x38] sm:$0xff pattern:$0x75316420] }
 0x1d7   :  { %1203 = vmatmul.msk.f32.vlgmr.msra.gmra.mxu2 %vm351_vm5, %v1522_v0  ;;  %1205 = vmatmul.msk.f32.vlgmr.msra.gmra.mxu3 %vm351_vm5, %v1522_v0  ;;  %759 = vst [vmem:[#allocation1] ss:$2 sm:$0xff] %v751_v1 }
 0x1d8   :  { %1206 = vmatpush.msk.msrb.mxu0 %vm118_vm0, %v546_v18  ;;  %1208 = vmatpush.msk.msrb.mxu1 %vm118_vm0, %v547_v19  ;;  %761 = vst [vmem:[#allocation1 + $0x10] ss:$2 sm:$0xff] %v752_v16 }
 0x1d9   :  { %1210 = vmatpush.msk.msrb.mxu2 %vm118_vm0, %v548_v20  ;;  %1212 = vmatpush.msk.msrb.mxu3 %vm118_vm0, %v549_v21  ;;  %763 = vst [vmem:[#allocation1 + $0x20] ss:$2 sm:$0xff] %v753_v17 }
 0x1da   :  { %765 = vst [vmem:[#allocation1 + $0x30] ss:$2 sm:$0xff] %v754_v22 }
 0x1de   :  { %1207 = vmatmul.msk.f32.vlgmr.msrb.gmra.mxu0 %vm351_vm5, %v1522_v0  ;;  %1209 = vmatmul.msk.f32.vlgmr.msrb.gmra.mxu1 %vm351_vm5, %v1522_v0  ;;  %v766_v27 = vld.sshfl [vmem:[#allocation1] sm:$0xff pattern:$0x75316420]  ;;  %v767_v28 = vld.sshfl [vmem:[#allocation1 + $0x8] sm:$0xff pattern:$0x75316420] }
 0x1df   :  { %1211 = vmatmul.msk.f32.vlgmr.msrb.gmra.mxu2 %vm351_vm5, %v1522_v0  ;;  %1213 = vmatmul.msk.f32.vlgmr.msrb.gmra.mxu3 %vm351_vm5, %v1522_v0  ;;  %954 = vst [vmem:[#allocation1] ss:$2 sm:$0xff] %v321_v25  ;;  %v768_v4 = vld.sshfl [vmem:[#allocation1 + $0x10] sm:$0xff pattern:$0x75316420] }
 0x1e0   :  { %1214 = vmatpush.msk.msra.mxu0 %vm118_vm0, %v766_v27  ;;  %1216 = vmatpush.msk.msra.mxu1 %vm118_vm0, %v767_v28  ;;  %v769_v30 = vld.sshfl [vmem:[#allocation1 + $0x18] sm:$0xff pattern:$0x75316420]  ;;  %v770_v31 = vld.sshfl [vmem:[#allocation1 + $0x20] sm:$0xff pattern:$0x75316420] }
 0x1e1   :  { %1218 = vmatpush.msk.msra.mxu2 %vm118_vm0, %v768_v4  ;;  %1220 = vmatpush.msk.msra.mxu3 %vm118_vm0, %v769_v30  ;;  %956 = vst [vmem:[#allocation1 + $0x10] ss:$2 sm:$0xff] %v322_v29  ;;  %v771_v32 = vld.sshfl [vmem:[#allocation1 + $0x28] sm:$0xff pattern:$0x75316420] }
 0x1e2   :  { %1222 = vmatpush.msk.msrb.mxu0 %vm118_vm0, %v770_v31  ;;  %1224 = vmatpush.msk.msrb.mxu1 %vm118_vm0, %v771_v32  ;;  %958 = vst [vmem:[#allocation1 + $0x20] ss:$2 sm:$0xff] %v323_v5  ;;  %v772_v8 = vld.sshfl [vmem:[#allocation1 + $0x30] sm:$0xff pattern:$0x75316420] }
 0x1e3   :  { %1226 = vmatpush.msk.msrb.mxu2 %vm118_vm0, %v772_v8  ;;  %v773_v34 = vld.sshfl [vmem:[#allocation1 + $0x38] sm:$0xff pattern:$0x75316420] }
 0x1e4   :  { %1228 = vmatpush.msk.msrb.mxu3 %vm118_vm0, %v773_v34  ;;  %960 = vst [vmem:[#allocation1 + $0x30] ss:$2 sm:$0xff] %v324_v33 }
 0x1e6   :  { %1215 = vmatmul.msk.f32.vlgmr.msra.gmra.mxu0 %vm351_vm5, %v1484_v45  ;;  %1217 = vmatmul.msk.f32.vlgmr.msra.gmra.mxu1 %vm351_vm5, %v1484_v45  ;;  %v961_v35 = vld.sshfl [vmem:[#allocation1] sm:$0xff pattern:$0x75316420]  ;;  %v962_v36 = vld.sshfl [vmem:[#allocation1 + $0x8] sm:$0xff pattern:$0x75316420] }
 0x1e7   :  { %1219 = vmatmul.msk.f32.vlgmr.msra.gmra.mxu2 %vm351_vm5, %v1484_v45  ;;  %1221 = vmatmul.msk.f32.vlgmr.msra.gmra.mxu3 %vm351_vm5, %v1484_v45 }
 0x1e8   :  { %1230 = vmatpush.msk.msra.mxu0 %vm118_vm0, %v961_v35  ;;  %1232 = vmatpush.msk.msra.mxu1 %vm118_vm0, %v962_v36  ;;  %v963_v37 = vld.sshfl [vmem:[#allocation1 + $0x10] sm:$0xff pattern:$0x75316420]  ;;  %v964_v38 = vld.sshfl [vmem:[#allocation1 + $0x18] sm:$0xff pattern:$0x75316420] }
 0x1e9   :  { %1234 = vmatpush.msk.msra.mxu2 %vm118_vm0, %v963_v37  ;;  %1236 = vmatpush.msk.msra.mxu3 %vm118_vm0, %v964_v38  ;;  %v965_v39 = vld.sshfl [vmem:[#allocation1 + $0x20] sm:$0xff pattern:$0x75316420]  ;;  %v966_v40 = vld.sshfl [vmem:[#allocation1 + $0x28] sm:$0xff pattern:$0x75316420] }
 0x1ea   :  { %v428_v44 = vpop.f32.mrf.mxu2 }
 0x1eb   :  { %v967_v7 = vld.sshfl [vmem:[#allocation1 + $0x30] sm:$0xff pattern:$0x75316420]  ;;  %v968_v41 = vld.sshfl [vmem:[#allocation1 + $0x38] sm:$0xff pattern:$0x75316420] }
 0x1ee   :  { %1223 = vmatmul.msk.f32.vlgmr.msrb.gmra.mxu0 %vm351_vm5, %v1484_v45  ;;  %1225 = vmatmul.msk.f32.vlgmr.msrb.gmra.mxu1 %vm351_vm5, %v1484_v45 }
 0x1ef   :  { %1227 = vmatmul.msk.f32.vlgmr.msrb.gmra.mxu2 %vm351_vm5, %v1484_v45  ;;  %1229 = vmatmul.msk.f32.vlgmr.msrb.gmra.mxu3 %vm351_vm5, %v1484_v45  ;;  %v448_v45 = vpop.f32.mrf.mxu3 }
 0x1f0   :  { %1238 = vmatpush.msk.msrb.mxu0 %vm118_vm0, %v965_v39  ;;  %1240 = vmatpush.msk.msrb.mxu1 %vm118_vm0, %v966_v40 }
 0x1f1   :  { %1242 = vmatpush.msk.msrb.mxu2 %vm118_vm0, %v967_v7  ;;  %1244 = vmatpush.msk.msrb.mxu3 %vm118_vm0, %v968_v41 }
 0x1f2   :  { %v508_v12 = vpop.f32.mrf.mxu2 }
 0x1f6   :  { %1231 = vmatmul.msk.f32.vlgmr.msra.gmra.mxu0 %vm351_vm5, %v1522_v0  ;;  %1233 = vmatmul.msk.f32.vlgmr.msra.gmra.mxu1 %vm351_vm5, %v1522_v0 }
 0x1f7   :  { %1235 = vmatmul.msk.f32.vlgmr.msra.gmra.mxu2 %vm351_vm5, %v1522_v0  ;;  %1237 = vmatmul.msk.f32.vlgmr.msra.gmra.mxu3 %vm351_vm5, %v1522_v0  ;;  %v528_v48 = vpop.f32.mrf.mxu3 }
 0x1fe   :  { %1239 = vmatmul.msk.f32.vlgmr.msrb.gmra.mxu0 %vm351_vm5, %v1522_v0  ;;  %1241 = vmatmul.msk.f32.vlgmr.msrb.gmra.mxu1 %vm351_vm5, %v1522_v0 }
 0x1ff   :  { %1243 = vmatmul.msk.f32.vlgmr.msrb.gmra.mxu2 %vm351_vm5, %v1522_v0  ;;  %1245 = vmatmul.msk.f32.vlgmr.msrb.gmra.mxu3 %vm351_vm5, %v1522_v0 }
 0x253   :  { %v586_v50 = vpop.f32.mrf.mxu0  ;;  %v606_v51 = vpop.f32.mrf.mxu1 }
 0x254   :  { %v587_v52 = vadd.f32 %v586_v50, %v388_v42  ;;  %v607_v53 = vadd.f32 %v606_v51, %v408_v43 }
 0x256   :  { %v734_v54 = vadd.f32 %v1600_v49, %v587_v52  ;;  %v735_v55 = vadd.f32 %v1600_v49, %v607_v53 }
 0x258   :  { %742 = vst [vmem:[#allocation7] sm:$0xff] %v734_v54 }
 0x259   :  { %743 = vst [vmem:[#allocation7 + $0x8] sm:$0xff] %v735_v55 }
 0x25a   :  { %v626_v56 = vpop.f32.mrf.mxu2  ;;  %v646_v57 = vpop.f32.mrf.mxu3 }
 0x25b   :  { %v627_v58 = vadd.f32 %v626_v56, %v428_v44  ;;  %v647_v59 = vadd.f32 %v646_v57, %v448_v45  ;;  %v666_v60 = vpop.f32.mrf.mxu0  ;;  %v686_v61 = vpop.f32.mrf.mxu1 }
 0x25c   :  { %v667_v62 = vadd.f32 %v666_v60, %v468_v46  ;;  %v687_v63 = vadd.f32 %v686_v61, %v488_v47 }
 0x25d   :  { %v736_v6 = vadd.f32 %v1600_v49, %v627_v58  ;;  %v737_v9 = vadd.f32 %v1600_v49, %v647_v59 }
 0x25e   :  { %v738_v11 = vadd.f32 %v1600_v49, %v667_v62  ;;  %v739_v13 = vadd.f32 %v1600_v49, %v687_v63 }
 0x25f   :  { %744 = vst [vmem:[#allocation7 + $0x10] sm:$0xff] %v736_v6 }
 0x260   :  { %745 = vst [vmem:[#allocation7 + $0x18] sm:$0xff] %v737_v9 }
 0x261   :  { %746 = vst [vmem:[#allocation7 + $0x20] sm:$0xff] %v738_v11 }
 0x262   :  { %747 = vst [vmem:[#allocation7 + $0x28] sm:$0xff] %v739_v13  ;;  %v706_v0 = vpop.f32.mrf.mxu2  ;;  %v726_v1 = vpop.f32.mrf.mxu3 }
 0x263   :  { %v707_v14 = vadd.f32 %v706_v0, %v508_v12  ;;  %v727_v2 = vadd.f32 %v726_v1, %v528_v48  ;;  %v807_v16 = vpop.f32.mrf.mxu0  ;;  %v827_v3 = vpop.f32.mrf.mxu1 }
 0x265   :  { %v740_v10 = vadd.f32 %v1600_v49, %v707_v14  ;;  %v741_v17 = vadd.f32 %v1600_v49, %v727_v2 }
 0x267   :  { %748 = vst [vmem:[#allocation7 + $0x30] sm:$0xff] %v740_v10 }
 0x268   :  { %749 = vst [vmem:[#allocation7 + $0x38] sm:$0xff] %v741_v17 }
 0x26a   :  { %v847_v18 = vpop.f32.mrf.mxu2  ;;  %v867_v19 = vpop.f32.mrf.mxu3 }
 0x26b   :  { %v887_v20 = vpop.f32.mrf.mxu0  ;;  %v907_v21 = vpop.f32.mrf.mxu1 }
 0x272   :  { %v927_v22 = vpop.f32.mrf.mxu2  ;;  %v947_v23 = vpop.f32.mrf.mxu3 }
 0x273   :  { %v1002_v24 = vpop.f32.mrf.mxu0  ;;  %v1022_v25 = vpop.f32.mrf.mxu1 }
 0x274   :  { %v1003_v26 = vadd.f32 %v1002_v24, %v807_v16  ;;  %v1023_v27 = vadd.f32 %v1022_v25, %v827_v3 }
 0x276   :  { %v1145_v28 = vadd.f32 %v1003_v26, %v1600_v49  ;;  %v1146_v29 = vadd.f32 %v1023_v27, %v1600_v49 }
 0x278   :  { %1154 = vst [vmem:[#allocation7 + $0x40] sm:$0xff] %v1145_v28 }
 0x279   :  { %1155 = vst [vmem:[#allocation7 + $0x48] sm:$0xff] %v1146_v29 }
 0x27a   :  { %v1042_v4 = vpop.f32.mrf.mxu2  ;;  %v1062_v15 = vpop.f32.mrf.mxu3 }
 0x27b   :  { %v1043_v5 = vadd.f32 %v1042_v4, %v847_v18  ;;  %v1063_v30 = vadd.f32 %v1062_v15, %v867_v19  ;;  %v1082_v31 = vpop.f32.mrf.mxu0  ;;  %v1102_v32 = vpop.f32.mrf.mxu1 }
 0x27c   :  { %v1083_v33 = vadd.f32 %v1082_v31, %v887_v20  ;;  %v1103_v8 = vadd.f32 %v1102_v32, %v907_v21 }
 0x27d   :  { %v1147_v34 = vadd.f32 %v1043_v5, %v1600_v49  ;;  %v1148_v35 = vadd.f32 %v1063_v30, %v1600_v49 }
 0x27e   :  { %v1149_v36 = vadd.f32 %v1083_v33, %v1600_v49  ;;  %v1150_v37 = vadd.f32 %v1103_v8, %v1600_v49 }
 0x27f   :  { %1156 = vst [vmem:[#allocation7 + $0x50] sm:$0xff] %v1147_v34 }
 0x280   :  { %1157 = vst [vmem:[#allocation7 + $0x58] sm:$0xff] %v1148_v35 }
 0x281   :  { %1158 = vst [vmem:[#allocation7 + $0x60] sm:$0xff] %v1149_v36 }
 0x282   :  { %1159 = vst [vmem:[#allocation7 + $0x68] sm:$0xff] %v1150_v37  ;;  %v1122_v38 = vpop.f32.mrf.mxu2  ;;  %v1142_v39 = vpop.f32.mrf.mxu3 }
 0x283   :  { %v1123_v40 = vadd.f32 %v1122_v38, %v927_v22  ;;  %v1143_v7 = vadd.f32 %v1142_v39, %v947_v23 }
 0x285   :  { %v1151_v41 = vadd.f32 %v1123_v40, %v1600_v49  ;;  %v1152_v42 = vadd.f32 %v1143_v7, %v1600_v49 }
 0x287   :  { %1160 = vst [vmem:[#allocation7 + $0x70] sm:$0xff] %v1151_v41 }
 0x288   :  { %1161 = vst [vmem:[#allocation7 + $0x78] sm:$0xff] %v1152_v42 }
 0x289   :  { %1174 = dma.vmem_to_hbm [thread:$0]  %s1167_s17, 2048, %s1169_s20, [#allocation4], %s1348_s21, %s1348_s21, %s1349_s22  }
 0x28a   :  { %1338 = dma.done.wait [#allocation4], 2048  }
 0x28b   :  { %1339 = vsyncadd [#allocation4], 4294965248 }
 0x28c   :  { %1179 = vsyncpa [#allocation3], 1 }
 0x28d   :  { %1180 = vsyncpa [#allocation6], 1 }
 0x28e   :  { %1181 = vsyncpa [#allocation4], 1 }

</bundles_post_ra>
